<compile_context>
chip_gen: v6e
topology: v6e:2x2x1
jax: 0.10.0
libtpu: 0.0.40
codegen_flags: <defaults>
</compile_context>

<pallas_src>
import functools

import jax
import jax.numpy as jnp
from jax.experimental import pallas as pl
from jax.experimental.pallas import tpu as pltpu


# ----------------------------------------------------------------------------- kernel
def _gated_conv1d_kernel(xcols_ref, w1_ref, w2_ref, b_ref, ln_ref,
                         out_ref, o1pad_ref, *, k, pad, L, c_in, c_out, use_proj):
    """One grid step processes Bn samples.

    xcols_ref : (Bn*L, k*c_in) bf16    pre-built im2col slab (wrapper-hoisted)
    w1_ref    : (k*c_in,  G1*c_out) bf16   [conv1A | conv1B | (convresid)]   G1 = 3 if proj else 2
    w2_ref    : (k*c_out, 2*c_out)  bf16   [conv2A | conv2B]
    b_ref     : (1, (G1+2)*c_out)   f32    [b1A | b1B | (bres) | b2A | b2B]
    ln_ref    : (L, 2*c_out)        f32    [gamma broadcast | beta broadcast]
    out_ref   : (Bn, c_out*L)       f32    torch-NCW layout, lane-dense (c_out*L % 128 == 0)
    o1pad_ref : (Bn, L+2*pad, c_out) f32   persistent VMEM scratch with padded out1
    """
    Bn = out_ref.shape[0]
    G1 = 3 if use_proj else 2

    # ---- gated conv block 1 (+ fused 1x1 residual projection): ONE bf16 MXU matmul ----
    x_cols = xcols_ref[...]                                          # (Bn*L, k*c_in) bf16
    z1 = jnp.dot(x_cols, w1_ref[...], preferred_element_type=jnp.float32)
    z1 = z1 + b_ref[:, :G1 * c_out]                                  # f32 from here on
    out1 = z1[:, :c_out] * jax.nn.sigmoid(z1[:, c_out:2 * c_out])    # (Bn*L, c_out)
    if use_proj:
        res = z1[:, 2 * c_out:3 * c_out]                             # convresid(x)
    else:
        # identity residual = center-tap columns of the im2col slab (bf16-rounded x)
        res = x_cols[:, pad * c_in:(pad + 1) * c_in].astype(jnp.float32)
    # dropout1 (p=0.2): identity at inference.

    # ---- re-pad out1 through the persistent VMEM scratch -----------------------------
    # Pad rows are re-zeroed EVERY step: a program_id==0 guard would be unsafe under the
    # parallel batch axis (v7x second core never runs block 0).
    o1pad_ref[:, pad:pad + L, :] = out1.reshape(Bn, L, c_out)
    if pad > 0:
        zeros = jnp.zeros((Bn, pad, c_out), jnp.float32)
        o1pad_ref[:, :pad, :] = zeros
        o1pad_ref[:, pad + L:, :] = zeros

    # ---- gated conv block 2: k accumulated MXU dots from shifted scratch views --------
    # (no (Bn*L, k*c_out) im2col slab is materialized; MXU is far from saturated anyway)
    z2 = None
    for t in range(k):
        y_t = o1pad_ref[:, t:t + L, :].reshape(Bn * L, c_out).astype(jnp.bfloat16)
        d = jnp.dot(y_t, w2_ref[t * c_out:(t + 1) * c_out, :],
                    preferred_element_type=jnp.float32)
        z2 = d if z2 is None else z2 + d
    z2 = z2 + b_ref[:, G1 * c_out:]
    out2 = z2[:, :c_out] * jax.nn.sigmoid(z2[:, c_out:])
    # dropout (p=0.2): identity at inference.

    # ---- residual + ReLU ---------------------------------------------------------------
    y = jax.nn.relu(out2 + res).reshape(Bn, L, c_out)

    # ---- LayerNorm(c_out): torch normalizes over its LAST axis (length L == c_out), with
    # per-position affine.  Single-pass stats: E[y], E[y^2].
    inv_l = 1.0 / L
    s1 = jnp.sum(y, axis=1, keepdims=True)
    s2 = jnp.sum(y * y, axis=1, keepdims=True)
    mean = s1 * inv_l
    var = s2 * inv_l - mean * mean
    y_norm = (y - mean) * jax.lax.rsqrt(var + 1e-5)
    gamma = ln_ref[:, :c_out]                                        # (L, c_out)
    beta = ln_ref[:, c_out:]
    y_aff = y_norm * gamma[None] + beta[None]                        # (Bn, L, c_out)

    # ---- fold torch's NCW layout into the store: (Bn, c_out*L) is lane-dense (256 lanes),
    # so the writeback is an unmasked vst and no post-kernel HBM transpose is needed.
    out_ref[...] = jnp.transpose(y_aff, (0, 2, 1)).reshape(Bn, c_out * L).astype(out_ref.dtype)


# ----------------------------------------------------------------------------- wrapper
def gated_conv1d_layer(x, params, *, block_batch=None):
    """x: (N, c_in, L) torch NCW layout.  Returns (N, c_out, L)."""
    N, c_in, L = x.shape
    w1A = params["w1A"]                                    # (c_out, c_in, k)
    c_out, _, k = w1A.shape
    pad = (k - 1) // 2
    assert L == c_out, "nn.LayerNorm(c_out) on (N, c_out, L) requires L == c_out"
    use_proj = c_in != c_out
    G1 = 3 if use_proj else 2

    # Samples per grid step: target Bn*L ~ 2048 matmul rows, Bn a multiple of 8 so the
    # (Bn, c_out*L) output block is sublane-dense.  Keep n_blocks >= 2 when N allows so
    # v7x's two TensorCores both get work (parallel batch axis).
    if block_batch is None:
        target_rows = 2048
        Bn = max(1, target_rows // L)
        if N < 2 * Bn:
            Bn = max(1, -(-N // 2))
        if Bn % 8 != 0:
            Bn = N if N <= 8 else ((Bn + 7) // 8) * 8     # block == full batch dim, or /8
    else:
        Bn = block_batch
    n_blocks = -(-N // Bn)
    N_pad = n_blocks * Bn

    # glue: NCW -> channels-last, bf16, pad batch + length, build the block-1 im2col slab
    # with XLA (hoisted out of the kernel).  Column t*c_in + i holds x_padded[:, l + t, i].
    x_cl = jnp.transpose(x, (0, 2, 1)).astype(jnp.bfloat16)                 # (N, L, c_in)
    x_padL = jnp.pad(x_cl, ((0, N_pad - N), (pad, pad), (0, 0)))            # (N_pad, Lp, c_in)
    x_cols = jnp.concatenate([x_padL[:, t:t + L, :] for t in range(k)], axis=-1)
    x_cols = x_cols.reshape(N_pad * L, k * c_in)                            # (N_pad*L, k*c_in)

    def pack_conv(w):  # torch (c_out, ci, k) -> (k*ci, c_out), row index = t*ci + i
        ci = w.shape[1]
        return jnp.transpose(w, (2, 1, 0)).reshape(k * ci, c_out).astype(jnp.float32)

    w1_parts = [pack_conv(params["w1A"]), pack_conv(params["w1B"])]
    b_parts = [params["b1A"], params["b1B"]]
    if use_proj:
        # 1x1 residual projection fused into the block-1 matmul: only the center-tap rows.
        wres = jnp.transpose(params["wres"][:, :, 0], (1, 0)).astype(jnp.float32)  # (c_in, c_out)
        wres_ext = jnp.zeros((k * c_in, c_out), jnp.float32)
        wres_ext = wres_ext.at[pad * c_in:(pad + 1) * c_in, :].set(wres)
        w1_parts.append(wres_ext)
        b_parts.append(params["bres"])
    b_parts += [params["b2A"], params["b2B"]]

    w1_cat = jnp.concatenate(w1_parts, axis=1).astype(jnp.bfloat16)          # (k*c_in, G1*c_out)
    w2_cat = jnp.concatenate([pack_conv(params["w2A"]),
                              pack_conv(params["w2B"])], axis=1).astype(jnp.bfloat16)
    b_all = jnp.concatenate([b.astype(jnp.float32) for b in b_parts]).reshape(1, -1)
    ln_cat = jnp.concatenate(
        [jnp.broadcast_to(params["ln_w"].astype(jnp.float32)[:, None], (L, c_out)),
         jnp.broadcast_to(params["ln_b"].astype(jnp.float32)[:, None], (L, c_out))],
        axis=1)                                                              # (L, 2*c_out)

    CL = c_out * L
    full = lambda shape: pl.BlockSpec(shape, lambda n: (0,) * len(shape))
    out_flat = pl.pallas_call(
        functools.partial(_gated_conv1d_kernel, k=k, pad=pad, L=L,
                          c_in=c_in, c_out=c_out, use_proj=use_proj),
        out_shape=jax.ShapeDtypeStruct((N_pad, CL), jnp.float32),
        grid_spec=pltpu.PrefetchScalarGridSpec(
            num_scalar_prefetch=0,
            grid=(n_blocks,),
            in_specs=[
                pl.BlockSpec((Bn * L, k * c_in), lambda n: (n, 0)),
                full((k * c_in, G1 * c_out)),
                full((k * c_out, 2 * c_out)),
                full((1, (G1 + 2) * c_out)),
                full((L, 2 * c_out)),
            ],
            out_specs=pl.BlockSpec((Bn, CL), lambda n: (n, 0)),
            scratch_shapes=[pltpu.VMEM((Bn, L + 2 * pad, c_out), jnp.float32)],
        ),
        # batch axis is independent: shards across v7x's 2 TensorCores, neutral on v5e/v6e
        compiler_params=pltpu.CompilerParams(
            dimension_semantics=("parallel",),
            vmem_limit_bytes=32 * 1024 * 1024,
        ),
    )(x_cols, w1_cat, w2_cat, b_all, ln_cat)

    # Kernel already stored torch layout (c-major, l-minor) per sample: reshape is free.
    return out_flat[:N].reshape(N, c_out, L)


# ----------------------------------------------------------------------------- pure-JAX reference
def ref_forward(x, params):
    c_out, c_in, k = params["w1A"].shape
    pad = (k - 1) // 2

    def conv(inp, w, b):
        y = jax.lax.conv_general_dilated(inp, w, (1,), "VALID",
                                         dimension_numbers=("NCH", "OIH", "NCH"))
        return y + b[None, :, None]

    xp = jnp.pad(x, ((0, 0), (0, 0), (pad, pad)))
    out1 = conv(xp, params["w1A"], params["b1A"]) * jax.nn.sigmoid(
        conv(xp, params["w1B"], params["b1B"]))
    out1p = jnp.pad(out1, ((0, 0), (0, 0), (pad, pad)))
    out2 = conv(out1p, params["w2A"], params["b2A"]) * jax.nn.sigmoid(
        conv(out1p, params["w2B"], params["b2B"]))
    res = conv(x, params["wres"], params["bres"]) if c_in != c_out else x
    y = jax.nn.relu(out2 + res)
    mean = y.mean(-1, keepdims=True)
    var = ((y - mean) ** 2).mean(-1, keepdims=True)
    yn = (y - mean) / jnp.sqrt(var + 1e-5)
    return yn * params["ln_w"][None, None, :] + params["ln_b"][None, None, :]


# ----------------------------------------------------------------------------- main
if __name__ == "__main__":
    N, c_in, c_out, L, k = 2, 8, 16, 16, 3   # L == c_out (required by the module's LayerNorm)

    key = jax.random.PRNGKey(0)
    keys = jax.random.split(key, 12)
    params = {
        "w1A": 0.2 * jax.random.normal(keys[0], (c_out, c_in, k), jnp.float32),
        "b1A": 0.1 * jax.random.normal(keys[1], (c_out,), jnp.float32),
        "w1B": 0.2 * jax.random.normal(keys[2], (c_out, c_in, k), jnp.float32),
        "b1B": 0.1 * jax.random.normal(keys[3], (c_out,), jnp.float32),
        "w2A": 0.2 * jax.random.normal(keys[4], (c_out, c_out, k), jnp.float32),
        "b2A": 0.1 * jax.random.normal(keys[5], (c_out,), jnp.float32),
        "w2B": 0.2 * jax.random.normal(keys[6], (c_out, c_out, k), jnp.float32),
        "b2B": 0.1 * jax.random.normal(keys[7], (c_out,), jnp.float32),
        "wres": 0.2 * jax.random.normal(keys[8], (c_out, c_in, 1), jnp.float32),
        "bres": 0.1 * jax.random.normal(keys[9], (c_out,), jnp.float32),
        "ln_w": 1.0 + 0.1 * jax.random.normal(keys[10], (c_out,), jnp.float32),
        "ln_b": 0.1 * jax.random.normal(keys[11], (c_out,), jnp.float32),
    }
    x = jax.random.normal(jax.random.PRNGKey(42), (N, c_in, L), jnp.float32)

    out = jax.block_until_ready(gated_conv1d_layer(x, params))
    ref = jax.block_until_ready(ref_forward(x, params))

    assert out.shape == (N, c_out, L), out.shape
    # bf16 MXU operands (f32 accumulation) vs. the pure-f32 reference: tolerance loosened.
    assert jnp.allclose(out, ref, rtol=5e-2, atol=5e-2), float(jnp.max(jnp.abs(out - ref)))
    print("KERNEL_OK")
</pallas_src>

<mosaic_0001>
module attributes {stable_mosaic.version = 11 : i64} {
  func.func @_gated_conv1d_kernel(%arg0: i32, %arg1: memref<32x24xbf16, #tpu.memory_space<vmem>>, %arg2: memref<24x48xbf16, #tpu.memory_space<vmem>>, %arg3: memref<48x32xbf16, #tpu.memory_space<vmem>>, %arg4: memref<1x80xf32, #tpu.memory_space<vmem>>, %arg5: memref<16x32xf32, #tpu.memory_space<vmem>>, %arg6: memref<2x256xf32, #tpu.memory_space<vmem>>, %arg7: memref<2x18x16xf32, #tpu.memory_space<vmem>>) attributes {dimension_semantics = [#tpu.dimension_semantics<parallel>], iteration_bounds = array<i64: 1>, scalar_prefetch = 0 : i64, scratch_operands = 1 : i64, tpu.core_type = #tpu.core_type<tc>, window_params = [{transform_indices = @transform_0, window_bounds = array<i64: 32, 24>}, {pipeline_mode = #tpu.pipeline_mode<synchronous>, transform_indices = @transform_1, window_bounds = array<i64: 24, 48>}, {pipeline_mode = #tpu.pipeline_mode<synchronous>, transform_indices = @transform_2, window_bounds = array<i64: 48, 32>}, {pipeline_mode = #tpu.pipeline_mode<synchronous>, transform_indices = @transform_3, window_bounds = array<i64: 1, 80>}, {pipeline_mode = #tpu.pipeline_mode<synchronous>, transform_indices = @transform_4, window_bounds = array<i64: 16, 32>}, {transform_indices = @transform_5, window_bounds = array<i64: 2, 256>}]} {
    %c0 = arith.constant 0 : index
    %c0_0 = arith.constant 0 : index
    %0 = vector.load %arg1[%c0, %c0_0] : memref<32x24xbf16, #tpu.memory_space<vmem>>, vector<32x24xbf16>
    %c0_1 = arith.constant 0 : index
    %c0_2 = arith.constant 0 : index
    %1 = vector.load %arg2[%c0_1, %c0_2] : memref<24x48xbf16, #tpu.memory_space<vmem>>, vector<24x48xbf16>
    %cst = arith.constant dense<0.000000e+00> : vector<32x48xf32>
    %2 = tpu.matmul %0, %1, %cst {dimension_numbers = #tpu.dot_dimension_numbers<[1], [0], [0], [1], [0, 0, 1, 1], [], []>} : vector<32x24xbf16>, vector<24x48xbf16>, vector<32x48xf32> -> vector<32x48xf32>
    %c0_3 = arith.constant 0 : index
    %c0_4 = arith.constant 0 : index
    %3 = vector.load %arg4[%c0_3, %c0_4] : memref<1x80xf32, #tpu.memory_space<vmem>>, vector<1x48xf32>
    %4 = vector.broadcast %3 : vector<1x48xf32> to vector<32x48xf32>
    %5 = arith.addf %2, %4 : vector<32x48xf32>
    %6 = vector.extract_strided_slice %5 {offsets = [0, 0], sizes = [32, 16], strides = [1, 1]} : vector<32x48xf32> to vector<32x16xf32>
    %7 = vector.extract_strided_slice %5 {offsets = [0, 16], sizes = [32, 16], strides = [1, 1]} : vector<32x48xf32> to vector<32x16xf32>
    %8 = arith.negf %7 : vector<32x16xf32>
    %9 = math.exp %8 : vector<32x16xf32>
    %cst_5 = arith.constant 1.000000e+00 : f32
    %10 = vector.broadcast %cst_5 : f32 to vector<32x16xf32>
    %11 = arith.addf %10, %9 : vector<32x16xf32>
    %12 = arith.divf %10, %11 : vector<32x16xf32>
    %13 = arith.mulf %6, %12 : vector<32x16xf32>
    %14 = vector.extract_strided_slice %5 {offsets = [0, 32], sizes = [32, 16], strides = [1, 1]} : vector<32x48xf32> to vector<32x16xf32>
    %15 = vector.shape_cast %13 : vector<32x16xf32> to vector<2x16x16xf32>
    %c0_6 = arith.constant 0 : index
    %c1 = arith.constant 1 : index
    %c0_7 = arith.constant 0 : index
    %16 = vector.load %arg7[%c0_6, %c1, %c0_7] : memref<2x18x16xf32, #tpu.memory_space<vmem>>, vector<2x16x16xf32>
    tpu.vector_store %arg7[%c0_6, %c1, %c0_7], %15 {strides = array<i32>} : memref<2x18x16xf32, #tpu.memory_space<vmem>>, vector<2x16x16xf32>,
    %cst_8 = arith.constant 0.000000e+00 : f32
    %17 = vector.broadcast %cst_8 : f32 to vector<2x1x16xf32>
    %c0_9 = arith.constant 0 : index
    %c0_10 = arith.constant 0 : index
    %c0_11 = arith.constant 0 : index
    %18 = vector.load %arg7[%c0_9, %c0_10, %c0_11] : memref<2x18x16xf32, #tpu.memory_space<vmem>>, vector<2x1x16xf32>
    tpu.vector_store %arg7[%c0_9, %c0_10, %c0_11], %17 {strides = array<i32>} : memref<2x18x16xf32, #tpu.memory_space<vmem>>, vector<2x1x16xf32>,
    %c0_12 = arith.constant 0 : index
    %c17 = arith.constant 17 : index
    %c0_13 = arith.constant 0 : index
    %19 = vector.load %arg7[%c0_12, %c17, %c0_13] : memref<2x18x16xf32, #tpu.memory_space<vmem>>, vector<2x1x16xf32>
    tpu.vector_store %arg7[%c0_12, %c17, %c0_13], %17 {strides = array<i32>} : memref<2x18x16xf32, #tpu.memory_space<vmem>>, vector<2x1x16xf32>,
    %c0_14 = arith.constant 0 : index
    %c0_15 = arith.constant 0 : index
    %c0_16 = arith.constant 0 : index
    %20 = vector.load %arg7[%c0_14, %c0_15, %c0_16] : memref<2x18x16xf32, #tpu.memory_space<vmem>>, vector<2x16x16xf32>
    %21 = vector.shape_cast %20 : vector<2x16x16xf32> to vector<32x16xf32>
    %22 = arith.truncf %21 : vector<32x16xf32> to vector<32x16xbf16>
    %c0_17 = arith.constant 0 : index
    %c0_18 = arith.constant 0 : index
    %23 = vector.load %arg3[%c0_17, %c0_18] : memref<48x32xbf16, #tpu.memory_space<vmem>>, vector<16x32xbf16>
    %cst_19 = arith.constant dense<0.000000e+00> : vector<32x32xf32>
    %24 = tpu.matmul %22, %23, %cst_19 {dimension_numbers = #tpu.dot_dimension_numbers<[1], [0], [0], [1], [0, 0, 1, 1], [], []>} : vector<32x16xbf16>, vector<16x32xbf16>, vector<32x32xf32> -> vector<32x32xf32>
    %c0_20 = arith.constant 0 : index
    %c1_21 = arith.constant 1 : index
    %c0_22 = arith.constant 0 : index
    %25 = vector.load %arg7[%c0_20, %c1_21, %c0_22] : memref<2x18x16xf32, #tpu.memory_space<vmem>>, vector<2x16x16xf32>
    %26 = vector.shape_cast %25 : vector<2x16x16xf32> to vector<32x16xf32>
    %27 = arith.truncf %26 : vector<32x16xf32> to vector<32x16xbf16>
    %c16 = arith.constant 16 : index
    %c0_23 = arith.constant 0 : index
    %28 = vector.load %arg3[%c16, %c0_23] : memref<48x32xbf16, #tpu.memory_space<vmem>>, vector<16x32xbf16>
    %cst_24 = arith.constant dense<0.000000e+00> : vector<32x32xf32>
    %29 = tpu.matmul %27, %28, %cst_24 {dimension_numbers = #tpu.dot_dimension_numbers<[1], [0], [0], [1], [0, 0, 1, 1], [], []>} : vector<32x16xbf16>, vector<16x32xbf16>, vector<32x32xf32> -> vector<32x32xf32>
    %30 = arith.addf %24, %29 : vector<32x32xf32>
    %c0_25 = arith.constant 0 : index
    %c2 = arith.constant 2 : index
    %c0_26 = arith.constant 0 : index
    %31 = vector.load %arg7[%c0_25, %c2, %c0_26] : memref<2x18x16xf32, #tpu.memory_space<vmem>>, vector<2x16x16xf32>
    %32 = vector.shape_cast %31 : vector<2x16x16xf32> to vector<32x16xf32>
    %33 = arith.truncf %32 : vector<32x16xf32> to vector<32x16xbf16>
    %c32 = arith.constant 32 : index
    %c0_27 = arith.constant 0 : index
    %34 = vector.load %arg3[%c32, %c0_27] : memref<48x32xbf16, #tpu.memory_space<vmem>>, vector<16x32xbf16>
    %cst_28 = arith.constant dense<0.000000e+00> : vector<32x32xf32>
    %35 = tpu.matmul %33, %34, %cst_28 {dimension_numbers = #tpu.dot_dimension_numbers<[1], [0], [0], [1], [0, 0, 1, 1], [], []>} : vector<32x16xbf16>, vector<16x32xbf16>, vector<32x32xf32> -> vector<32x32xf32>
    %36 = arith.addf %30, %35 : vector<32x32xf32>
    %c0_29 = arith.constant 0 : index
    %c48 = arith.constant 48 : index
    %37 = vector.load %arg4[%c0_29, %c48] : memref<1x80xf32, #tpu.memory_space<vmem>>, vector<1x32xf32>
    %38 = vector.broadcast %37 : vector<1x32xf32> to vector<32x32xf32>
    %39 = arith.addf %36, %38 : vector<32x32xf32>
    %40 = vector.extract_strided_slice %39 {offsets = [0, 0], sizes = [32, 16], strides = [1, 1]} : vector<32x32xf32> to vector<32x16xf32>
    %41 = vector.extract_strided_slice %39 {offsets = [0, 16], sizes = [32, 16], strides = [1, 1]} : vector<32x32xf32> to vector<32x16xf32>
    %42 = arith.negf %41 : vector<32x16xf32>
    %43 = math.exp %42 : vector<32x16xf32>
    %cst_30 = arith.constant 1.000000e+00 : f32
    %44 = vector.broadcast %cst_30 : f32 to vector<32x16xf32>
    %45 = arith.addf %44, %43 : vector<32x16xf32>
    %46 = arith.divf %44, %45 : vector<32x16xf32>
    %47 = arith.mulf %40, %46 : vector<32x16xf32>
    %48 = arith.addf %47, %14 : vector<32x16xf32>
    %cst_31 = arith.constant 0.000000e+00 : f32
    %49 = vector.broadcast %cst_31 : f32 to vector<32x16xf32>
    %50 = arith.maximumf %48, %49 : vector<32x16xf32>
    %51 = vector.shape_cast %50 : vector<32x16xf32> to vector<2x16x16xf32>
    %cst_32 = arith.constant dense<0.000000e+00> : vector<2x16xf32>
    %52 = vector.multi_reduction <add>, %51, %cst_32 [1] : vector<2x16x16xf32> to vector<2x16xf32>
    %53 = vector.shape_cast %52 : vector<2x16xf32> to vector<2x1x16xf32>
    %54 = arith.mulf %51, %51 : vector<2x16x16xf32>
    %cst_33 = arith.constant dense<0.000000e+00> : vector<2x16xf32>
    %55 = vector.multi_reduction <add>, %54, %cst_33 [1] : vector<2x16x16xf32> to vector<2x16xf32>
    %56 = vector.shape_cast %55 : vector<2x16xf32> to vector<2x1x16xf32>
    %cst_34 = arith.constant 6.250000e-02 : f32
    %57 = vector.broadcast %cst_34 : f32 to vector<2x1x16xf32>
    %58 = arith.mulf %53, %57 : vector<2x1x16xf32>
    %cst_35 = arith.constant 6.250000e-02 : f32
    %59 = vector.broadcast %cst_35 : f32 to vector<2x1x16xf32>
    %60 = arith.mulf %56, %59 : vector<2x1x16xf32>
    %61 = arith.mulf %58, %58 : vector<2x1x16xf32>
    %62 = arith.subf %60, %61 : vector<2x1x16xf32>
    %63 = vector.broadcast %58 : vector<2x1x16xf32> to vector<2x16x16xf32>
    %64 = arith.subf %51, %63 : vector<2x16x16xf32>
    %cst_36 = arith.constant 9.99999974E-6 : f32
    %65 = vector.broadcast %cst_36 : f32 to vector<2x1x16xf32>
    %66 = arith.addf %62, %65 : vector<2x1x16xf32>
    %67 = math.rsqrt %66 : vector<2x1x16xf32>
    %68 = vector.broadcast %67 : vector<2x1x16xf32> to vector<2x16x16xf32>
    %69 = arith.mulf %64, %68 : vector<2x16x16xf32>
    %c0_37 = arith.constant 0 : index
    %c0_38 = arith.constant 0 : index
    %70 = vector.load %arg5[%c0_37, %c0_38] : memref<16x32xf32, #tpu.memory_space<vmem>>, vector<16x16xf32>
    %c0_39 = arith.constant 0 : index
    %c16_40 = arith.constant 16 : index
    %71 = vector.load %arg5[%c0_39, %c16_40] : memref<16x32xf32, #tpu.memory_space<vmem>>, vector<16x16xf32>
    %72 = vector.shape_cast %70 : vector<16x16xf32> to vector<1x16x16xf32>
    %73 = vector.broadcast %72 : vector<1x16x16xf32> to vector<2x16x16xf32>
    %74 = arith.mulf %69, %73 : vector<2x16x16xf32>
    %75 = vector.shape_cast %71 : vector<16x16xf32> to vector<1x16x16xf32>
    %76 = vector.broadcast %75 : vector<1x16x16xf32> to vector<2x16x16xf32>
    %77 = arith.addf %74, %76 : vector<2x16x16xf32>
    %78 = tpu.transpose %77, [0, 2, 1] : vector<2x16x16xf32> -> vector<2x16x16xf32>
    %79 = vector.shape_cast %78 : vector<2x16x16xf32> to vector<2x256xf32>
    %c0_41 = arith.constant 0 : index
    %c0_42 = arith.constant 0 : index
    %80 = vector.load %arg6[%c0_41, %c0_42] : memref<2x256xf32, #tpu.memory_space<vmem>>, vector<2x256xf32>
    tpu.vector_store %arg6[%c0_41, %c0_42], %79 {strides = array<i32>} : memref<2x256xf32, #tpu.memory_space<vmem>>, vector<2x256xf32>,
    return
  }
  func.func @transform_0(%arg0: i32) -> (i32, i32) {
    %c0_i32 = arith.constant 0 : i32
    %c0_i32_0 = arith.constant 0 : i32
    return %arg0, %c0_i32 : i32, i32
  }
  func.func @transform_1(%arg0: i32) -> (i32, i32) {
    %c0_i32 = arith.constant 0 : i32
    %c0_i32_0 = arith.constant 0 : i32
    %c0_i32_1 = arith.constant 0 : i32
    return %c0_i32, %c0_i32_0 : i32, i32
  }
  func.func @transform_2(%arg0: i32) -> (i32, i32) {
    %c0_i32 = arith.constant 0 : i32
    %c0_i32_0 = arith.constant 0 : i32
    %c0_i32_1 = arith.constant 0 : i32
    return %c0_i32, %c0_i32_0 : i32, i32
  }
  func.func @transform_3(%arg0: i32) -> (i32, i32) {
    %c0_i32 = arith.constant 0 : i32
    %c0_i32_0 = arith.constant 0 : i32
    %c0_i32_1 = arith.constant 0 : i32
    return %c0_i32, %c0_i32_0 : i32, i32
  }
  func.func @transform_4(%arg0: i32) -> (i32, i32) {
    %c0_i32 = arith.constant 0 : i32
    %c0_i32_0 = arith.constant 0 : i32
    %c0_i32_1 = arith.constant 0 : i32
    return %c0_i32, %c0_i32_0 : i32, i32
  }
  func.func @transform_5(%arg0: i32) -> (i32, i32) {
    %c0_i32 = arith.constant 0 : i32
    %c0_i32_0 = arith.constant 0 : i32
    return %arg0, %c0_i32 : i32, i32
  }
}

</mosaic_0001>

<bundles_post_ra>
// kernel: tpu_custom_call.1
= control target key start
LH: loop header
LB: loop body
LE: loop exit
PB: predicated region body
PF: predicated region fallthrough
CT: control target
= control target key end

     0   :  { %vm62_vm0 = vcmask 1043456   ;;  %vm55_vm1 = vcmask 195584   ;;  %s1142_s0 = inlined_call_operand.vmem [shape: bf16[32,24], index: 0, kind: input, shape index: {}]   ;;  %s1143_s1 = inlined_call_operand.vmem [shape: bf16[24,48], index: 1, kind: input, shape index: {}]   ;;  %s1144_s2 = inlined_call_operand.vmem [shape: bf16[48,32], index: 2, kind: input, shape index: {}]   ;;  %s1145_s3 = inlined_call_operand.vmem [shape: f32[1,80], index: 3, kind: input, shape index: {}]   ;;  %s1146_s4 = inlined_call_operand.vmem [shape: f32[16,32], index: 4, kind: input, shape index: {}]   ;;  %s1147_s5 = inlined_call_operand.hbm [shape: f32[2,256], index: 5, kind: output, shape index: {}]  }
   0x1   :  { %v914_v0 = vld [vmem:[%s1143_s1 + $0x8] ss:$0 sps:$4 sm:$0xff]   ;;  %v915_v1 = vld [vmem:[%s1143_s1] sm:$0xff]  }
   0x2   :  { %902 = vmatprep.subr.msk.bf16.mxu0 %vm62_vm0, %v914_v0  ;;  %v64_v2 = vsel %vm62_vm0, %v914_v0, 0  ;;  %v916_v3 = vld [vmem:[%s1142_s0] sm:$0xff]  }
   0x3   :  { %877 = vmatpush3.bf16.msra.mxu0 %v64_v2  ;;  %880 = vmatprep.mubr.msk.bf16.mxu0 %vm55_vm1, %v916_v3 }
   0x4   :  { %878 = vmatprep.subr.bf16.mxu0 %v915_v1 }
   0x5   :  { %10 = vsyncpa [#allocation4], 0  ;;  %v917_v4 = vld [vmem:[%s1142_s0 + $0x8] sm:$0xff]   ;;  %v837_v5 = vld [vmem:[%s1145_s3] ss:$0 sm:$0xff]  ;;  %vm164_vm2 = vcmask 122880  }
   0x6   :  { %v979_v25 = vmov 0.0   ;;  %s980_s0 = smov 112   ;;  %v918_v28 = vld [vmem:[%s1144_s2 + $0x8] sm:$0xff]   ;;  %v919_v29 = vld [vmem:[%s1144_s2 + $0x10] sm:$0xff]   ;;  %v920_v33 = vld [vmem:[%s1144_s2] sm:$0xff]   ;;  %s981_s7 = smov 96  }
   0x7   :  { %879 = vmatpush3.bf16.msra.mxu0 %v915_v1  ;;  %167 = vst.msk [vmem:[#allocation2 + $0x11] sm:$0x1] %vm164_vm2, %v979_v25  ;;  %165 = vst.msk [vmem:[#allocation2] sm:$0x1] %vm164_vm2, %v979_v25  ;;  %884 = vmatprep.subr.bf16.mxu1 %v918_v28  ;;  %s982_s8 = smov 80   ;;  %vm159_vm3 = vcmask 130048  }
   0x8   :  { %166 = vst.msk [vmem:[#allocation2 + $0x18] sm:$0x1] %vm164_vm2, %v979_v25  ;;  %168 = vst.msk [vmem:[#allocation2 + $0x29] sm:$0x1] %vm164_vm2, %v979_v25  ;;  %885 = vmatpush3.bf16.msra.mxu1 %v918_v28  ;;  %896 = vmatprep.subr.bf16.mxu0 %v919_v29  ;;  %s986_s12 = smov 16   ;;  %s987_s13 = smov 48  }
   0x9   :  { %890 = vmatprep.subr.bf16.mxu1 %v920_v33  ;;  %s988_s14 = smov 64   ;;  %vm792_vm4 = vcmask 261120   ;;  %vm794_vm5 = vcmask 392192   ;;  %vm796_vm6 = vcmask 523264   ;;  %vm798_vm7 = vcmask 654336   ;;  %s989_s15 = smov [#allocation3]  }
   0xa   :  { %881 = vmatmul.mubr.msk.bf16.vlgmr.msra.gmra.mxu0 %vm55_vm1, %v917_v4  ;;  %vm800_vm8 = vcmask 785408   ;;  %vm802_vm9 = vcmask 916480   ;;  %s829_s16 = sshll.u32 %s989_s15, 4  ;;  %s830_s16 = int_to_ptr.vmem [resolvable:$true] %s829_s16 }
   0xb   :  { %897 = vmatpush3.bf16.msra.mxu0 %v919_v29  ;;  %s957_s17 = scalar_lea.vmem %s830_s16, 64  ;;  %p962_p1 = scmp.lt.s32.totalorder %s830_s16, %s830_s16 }
   0xc   :  { %p958_p0 = scmp.ne.s32.totalorder %s830_s16, %s957_s17  ;;  %p963_p2 = scmp.lt.s32.totalorder %s957_s17, %s957_s17 }
   0xe   :  { %p964_p3 = por %p963_p2, %p962_p1 }
  0x10   :  { %p965_p4 = pnand %p964_p3, %p958_p0 }
  0xca   :  { %v882_v6 = vpop.f32.mrf.mxu0 }
  0xcb   :  { %v1035_v7 = vadd.f32 %v882_v6, %v837_v5 }
  0xcc   :  { %v100_v8 = vpop.f32.mrf.mxu0 }
  0xcd   :  { %v846_v9 = vmul.f32 -1.442695, %v1035_v7  ;;  %v101_v10 = vadd.f32 %v837_v5, %v100_v8 }
  0xce   :  { %v883_v11 = vpop.f32.mrf.mxu0 }
  0xcf   :  { %921 = vpow2.f32 %v846_v9  ;;  %v844_v12 = vmul.f32 -1.442695, %v101_v10  ;;  %v1038_v13 = vadd.f32 %v883_v11, %v837_v5 }
  0xd0   :  { %v103_v14 = vpop.f32.mrf.mxu0 }
  0xd1   :  { %923 = vpow2.f32 %v844_v12  ;;  %v847_v15 = vmul.f32 -1.442695, %v1038_v13  ;;  %v104_v16 = vadd.f32 %v837_v5, %v103_v14 }
  0xd3   :  { %925 = vpow2.f32 %v847_v15  ;;  %v845_v17 = vmul.f32 -1.442695, %v104_v16 }
  0xd5   :  { %927 = vpow2.f32 %v845_v17 }
  0xdc   :  { %v922_v18 = vpop.eup %921 }
  0xdd   :  { %v129_v19 = vadd.f32 1.0, %v922_v18 }
  0xde   :  { %v924_v20 = vpop.eup %923 }
  0xdf   :  { %929 = vrcp.f32 %v129_v19  ;;  %v127_v21 = vadd.f32 1.0, %v924_v20 }
  0xe0   :  { %v926_v22 = vpop.eup %925 }
  0xe1   :  { %931 = vrcp.f32 %v127_v21  ;;  %v130_v23 = vadd.f32 1.0, %v926_v22 }
  0xe2   :  { %v928_v24 = vpop.eup %927 }
  0xe3   :  { %933 = vrcp.f32 %v130_v23  ;;  %v128_v26 = vadd.f32 1.0, %v928_v24 }
  0xe5   :  { %935 = vrcp.f32 %v128_v26 }
  0xec   :  { %v930_v27 = vpop.eup %929 }
  0xed   :  { %147 = vrot.lane.b32.xlu1 %v930_v27, %s980_s0 }
  0xee   :  { %v932_v30 = vpop.eup %931 }
  0xef   :  { %143 = vrot.lane.b32.xlu0 %v932_v30, %s980_s0 }
  0xf0   :  { %v934_v31 = vpop.eup %933 }
  0xf1   :  { %149 = vrot.lane.b32.xlu1 %v934_v31, %s980_s0 }
  0xf2   :  { %v936_v32 = vpop.eup %935 }
  0xf3   :  { %145 = vrot.lane.b32.xlu0 %v936_v32, %s980_s0 }
  0xf5   :  { %441 = vrot.lane.b32.xlu1 %v101_v10, %s981_s7 }
  0xf7   :  { %386 = vrot.lane.b32.xlu0 %v837_v5, %s982_s8 }
  0xfb   :  { %443 = vrot.lane.b32.xlu0 %v104_v16, %s981_s7 }
 0x15f   :  { %v148_v34 = vpop.permute.xlu1 %147 }
 0x160   :  { %v157_v35 = vmul.f32 %v148_v34, %v1035_v7 }
 0x161   :  { %v144_v36 = vpop.permute.xlu0 %143 }
 0x162   :  { %162 = vst.msk [vmem:[#allocation2 + $0x19] sm:$0xff] %vm159_vm3, %v157_v35  ;;  %v155_v37 = vmul.f32 %v144_v36, %v101_v10 }
 0x163   :  { %v150_v38 = vpop.permute.xlu1 %149 }
 0x164   :  { %160 = vst.msk [vmem:[#allocation2 + $0x1] sm:$0xff] %vm159_vm3, %v155_v37  ;;  %v158_v39 = vmul.f32 %v150_v38, %v1038_v13 }
 0x165   :  { %v146_v40 = vpop.permute.xlu0 %145 }
 0x166   :  { %163 = vst.msk [vmem:[#allocation2 + $0x21] sm:$0xff] %vm159_vm3, %v158_v39  ;;  %v156_v41 = vmul.f32 %v146_v40, %v104_v16  ;;  %v1082_v40 = vld [vmem:[%s1146_s4] sm:$0xff] }
 0x168   :  { %161 = vst.msk [vmem:[#allocation2 + $0x9] sm:$0xff] %vm159_vm3, %v156_v41  ;;  %v1091_v41 = vld [vmem:[%s1146_s4 + $0x8] sm:$0xff]  ;;  %s985_s4 = smov 32  }
 0x169   :  { %v179_v51 = vld [vmem:[#allocation2 + $0x19] sm:$0xff]  ;;  %v387_v5 = vpop.permute.xlu0 %386 }
 0x16a   :  { %v171_v58 = vld [vmem:[#allocation2 + $0x18] sm:$0xff] }
 0x16b   :  { %v177_v42 = vld [vmem:[#allocation2 + $0x1] sm:$0xff] }
 0x16c   :  { %v169_v55 = vld [vmem:[#allocation2] sm:$0xff] }
 0x16d   :  { %v180_v43 = vld [vmem:[#allocation2 + $0x21] sm:$0xff] }
 0x16e   :  { %v309_v44 = vld [vmem:[#allocation2 + $0x1a] sm:$0xff]  ;;  %v310_v45 = vld [vmem:[#allocation2 + $0x22] sm:$0xff]  ;;  %v182_v53 = vpack.c.bf16 %v180_v43, %v179_v51 }
 0x16f   :  { %v178_v46 = vld [vmem:[#allocation2 + $0x9] sm:$0xff]  ;;  %v312_v54 = vpack.c.bf16 %v310_v45, %v309_v44  ;;  %v172_v57 = vld [vmem:[#allocation2 + $0x20] sm:$0xff] }
 0x170   :  { %v307_v47 = vld [vmem:[#allocation2 + $0x2] sm:$0xff]  ;;  %v308_v48 = vld [vmem:[#allocation2 + $0xa] sm:$0xff]  ;;  %v181_v49 = vpack.c.bf16 %v178_v46, %v177_v42  ;;  %v174_v59 = vpack.c.bf16 %v172_v57, %v171_v58  ;;  %v444_v42 = vpop.permute.xlu0 %443 }
 0x171   :  { %v311_v50 = vpack.c.bf16 %v308_v48, %v307_v47  ;;  %v170_v52 = vld [vmem:[#allocation2 + $0x8] sm:$0xff] }
 0x172   :  { %886 = vmatprep.mubr.msk.bf16.mxu1 %vm159_vm3, %v181_v49  ;;  %v173_v56 = vpack.c.bf16 %v170_v52, %v169_v55 }
 0x173   :  { %898 = vmatprep.mubr.msk.bf16.mxu0 %vm159_vm3, %v311_v50  ;;  %887 = vmatmul.mubr.msk.bf16.vlgmr.msra.gmra.mxu1 %vm159_vm3, %v182_v53 }
 0x174   :  { %899 = vmatmul.mubr.msk.bf16.vlgmr.msra.gmra.mxu0 %vm159_vm3, %v312_v54  ;;  %891 = vmatpush3.bf16.msra.mxu1 %v920_v33 }
 0x175   :  { %892 = vmatprep.mubr.msk.bf16.mxu1 %vm159_vm3, %v173_v56 }
 0x17b   :  { %893 = vmatmul.mubr.msk.bf16.vlgmr.msra.gmra.mxu1 %vm159_vm3, %v174_v59 }
 0x233   :  { %v888_v60 = vpop.f32.mrf.mxu1 }
 0x234   :  { %v900_v62 = vpop.f32.mrf.mxu0 }
 0x235   :  { %v231_v61 = vpop.f32.mrf.mxu1 }
 0x236   :  { %v361_v1 = vpop.f32.mrf.mxu0 }
 0x237   :  { %v889_v63 = vpop.f32.mrf.mxu1 }
 0x238   :  { %v901_v9 = vpop.f32.mrf.mxu0 }
 0x239   :  { %v234_v0 = vpop.f32.mrf.mxu1 }
 0x23a   :  { %v364_v20 = vpop.f32.mrf.mxu0 }
 0x23b   :  { %v894_v2 = vpop.f32.mrf.mxu1 }
 0x23c   :  { %v301_v3 = vadd.f32 %v894_v2, %v888_v60 }
 0x23d   :  { %v292_v4 = vpop.f32.mrf.mxu1 }
 0x23e   :  { %v378_v6 = vadd.f32 %v900_v62, %v301_v3  ;;  %v293_v8 = vadd.f32 %v292_v4, %v231_v61 }
 0x23f   :  { %v895_v10 = vpop.f32.mrf.mxu1 }
 0x240   :  { %v391_v11 = vadd.f32 %v387_v5, %v378_v6  ;;  %v376_v12 = vadd.f32 %v361_v1, %v293_v8  ;;  %v304_v14 = vadd.f32 %v895_v10, %v889_v63 }
 0x241   :  { %v295_v15 = vpop.f32.mrf.mxu1 }
 0x242   :  { %v860_v16 = vmul.f32 -1.442695, %v391_v11  ;;  %v389_v17 = vadd.f32 %v387_v5, %v376_v12  ;;  %v379_v18 = vadd.f32 %v901_v9, %v304_v14  ;;  %v296_v19 = vadd.f32 %v295_v15, %v234_v0 }
 0x244   :  { %937 = vpow2.f32 %v860_v16  ;;  %v858_v21 = vmul.f32 -1.442695, %v389_v17  ;;  %v392_v22 = vadd.f32 %v387_v5, %v379_v18  ;;  %v377_v23 = vadd.f32 %v364_v20, %v296_v19 }
 0x246   :  { %939 = vpow2.f32 %v858_v21  ;;  %v861_v24 = vmul.f32 -1.442695, %v392_v22  ;;  %v390_v26 = vadd.f32 %v387_v5, %v377_v23 }
 0x248   :  { %941 = vpow2.f32 %v861_v24  ;;  %v859_v27 = vmul.f32 -1.442695, %v390_v26 }
 0x24a   :  { %943 = vpow2.f32 %v859_v27 }
 0x251   :  { %v938_v28 = vpop.eup %937 }
 0x252   :  { %v407_v29 = vadd.f32 1.0, %v938_v28 }
 0x253   :  { %v940_v30 = vpop.eup %939 }
 0x254   :  { %945 = vrcp.f32 %v407_v29  ;;  %v405_v31 = vadd.f32 1.0, %v940_v30 }
 0x255   :  { %v942_v32 = vpop.eup %941 }
 0x256   :  { %v408_v33 = vadd.f32 1.0, %v942_v32  ;;  %947 = vrcp.f32 %v405_v31 }
 0x257   :  { %v944_v34 = vpop.eup %943 }
 0x258   :  { %949 = vrcp.f32 %v408_v33  ;;  %v406_v35 = vadd.f32 1.0, %v944_v34 }
 0x25a   :  { %951 = vrcp.f32 %v406_v35 }
 0x261   :  { %v946_v36 = vpop.eup %945 }
 0x262   :  { %425 = vrot.lane.b32.xlu1 %v946_v36, %s980_s0 }
 0x263   :  { %v948_v37 = vpop.eup %947 }
 0x265   :  { %v950_v38 = vpop.eup %949 }
 0x266   :  { %427 = vrot.lane.b32.xlu0 %v950_v38, %s980_s0  ;;  %421 = vrot.lane.b32.xlu1 %v948_v37, %s980_s0 }
 0x267   :  { %v952_v39 = vpop.eup %951 }
 0x26a   :  { %423 = vrot.lane.b32.xlu0 %v952_v39, %s980_s0  ;;  %445 = vrot.lane.b32.xlu1 %v1035_v7, %s981_s7  ;;  %v442_v7 = vpop.permute.xlu1 %441 }
 0x26e   :  { %447 = vrot.lane.b32.xlu0 %v1038_v13, %s981_s7  ;;  %529 = vrot.lane.b32.xlu1 %v1082_v40, %s980_s0 }
 0x272   :  { %531 = vrot.lane.b32.xlu0 %v1091_v41, %s980_s0 }
 0x2d4   :  { %v426_v43 = vpop.permute.xlu1 %425 }
 0x2d5   :  { %v435_v47 = vmul.f32 %v426_v43, %v391_v11 }
 0x2d8   :  { %v422_v44 = vpop.permute.xlu1 %421  ;;  %v428_v45 = vpop.permute.xlu0 %427 }
 0x2d9   :  { %v433_v46 = vmul.f32 %v422_v44, %v389_v17  ;;  %v436_v54 = vmul.f32 %v428_v45, %v392_v22 }
 0x2db   :  { %v453_v48 = vadd.f32 %v442_v7, %v433_v46 }
 0x2dc   :  { %v446_v13 = vpop.permute.xlu1 %445  ;;  %v424_v49 = vpop.permute.xlu0 %423 }
 0x2dd   :  { %v1095_v50 = vmax.f32 %v453_v48, 0.0  ;;  %v455_v51 = vadd.f32 %v446_v13, %v435_v47  ;;  %v434_v52 = vmul.f32 %v424_v49, %v390_v26 }
 0x2df   :  { %v454_v53 = vadd.f32 %v444_v42, %v434_v52  ;;  %v1097_v55 = vmax.f32 %v455_v51, 0.0  ;;  %v479_v57 = vmul.f32 %v1095_v50, %v1095_v50  ;;  %v461_v60 = vsel %vm159_vm3, %v1095_v50, 0.0 }
 0x2e0   :  { %v448_v56 = vpop.permute.xlu0 %447 }
 0x2e1   :  { %v458_v58 = vmax.f32 %v454_v53, 0.0  ;;  %v456_v59 = vadd.f32 %v448_v56, %v436_v54  ;;  %v481_v63 = vmul.f32 %v1097_v55, %v1097_v55  ;;  %v483_v2 = vsel %vm159_vm3, %v479_v57, 0.0  ;;  %v530_v57 = vpop.permute.xlu1 %529 }
 0x2e2   :  { %v470_v3 = vsel %vm159_vm3, %v1097_v55, 0.0 }
 0x2e3   :  { %v462_v61 = vsel %vm159_vm3, %v458_v58, 0.0  ;;  %v480_v62 = vmul.f32 %v458_v58, %v458_v58  ;;  %v460_v1 = vmax.f32 %v456_v59, 0.0  ;;  %v492_v11 = vsel %vm159_vm3, %v481_v63, 0.0 }
 0x2e4   :  { %v463_v0 = vadd.f32 %v462_v61, %v461_v60 }
 0x2e5   :  { %v484_v4 = vsel %vm159_vm3, %v480_v62, 0.0  ;;  %v471_v8 = vsel %vm159_vm3, %v460_v1, 0.0  ;;  %v482_v9 = vmul.f32 %v460_v1, %v460_v1 }
 0x2e6   :  { %v464_v5 = vrot.slane %v463_v0, 4  ;;  %v485_v6 = vadd.f32 %v484_v4, %v483_v2  ;;  %v472_v10 = vadd.f32 %v471_v8, %v470_v3  ;;  %v532_v3 = vpop.permute.xlu0 %531  ;;  %v607_v8 = vlaneseq }
 0x2e7   :  { %v493_v15 = vsel %vm159_vm3, %v482_v9, 0.0 }
 0x2e8   :  { %v465_v12 = vadd.f32 %v464_v5, %v463_v0  ;;  %v486_v14 = vrot.slane %v485_v6, 4  ;;  %v473_v16 = vrot.slane %v472_v10, 4  ;;  %v494_v17 = vadd.f32 %v493_v15, %v492_v11 }
 0x2e9   :  { %v984_v11 = vmov 1934713408  }
 0x2ea   :  { %v466_v18 = vrot.slane %v465_v12, 2  ;;  %v487_v19 = vadd.f32 %v486_v14, %v485_v6  ;;  %v474_v20 = vadd.f32 %v473_v16, %v472_v10  ;;  %v495_v21 = vrot.slane %v494_v17, 4 }
 0x2eb   :  { %v608_v10 = vshrl.u32 %v607_v8, 7 }
 0x2ec   :  { %v467_v22 = vadd.f32 %v466_v18, %v465_v12  ;;  %v488_v23 = vrot.slane %v487_v19, 2  ;;  %v475_v24 = vrot.slane %v474_v20, 2  ;;  %v496_v26 = vadd.f32 %v495_v21, %v494_v17 }
 0x2ed   :  { %v636_v12 = vunpack.c.l.s4 %v984_v11 }
 0x2ee   :  { %v468_v27 = vrot.slane %v467_v22, 1  ;;  %v489_v28 = vadd.f32 %v488_v23, %v487_v19  ;;  %v476_v29 = vadd.f32 %v475_v24, %v474_v20  ;;  %v497_v30 = vrot.slane %v496_v26, 2 }
 0x2ef   :  { %v637_v15 = vunpack.c.0.s8 %v636_v12 }
 0x2f0   :  { %v469_v31 = vadd.f32 %v468_v27, %v467_v22  ;;  %v490_v32 = vrot.slane %v489_v28, 1  ;;  %v477_v33 = vrot.slane %v476_v29, 1  ;;  %v498_v34 = vadd.f32 %v497_v30, %v496_v26 }
 0x2f2   :  { %v491_v35 = vadd.f32 %v490_v32, %v489_v28  ;;  %v501_v36 = vmul.f32 0.0625, %v469_v31  ;;  %v478_v37 = vadd.f32 %v477_v33, %v476_v29  ;;  %v499_v38 = vrot.slane %v498_v34, 1 }
 0x2f4   :  { %v503_v39 = vmul.f32 0.0625, %v491_v35  ;;  %v505_v7 = vmul.f32 %v501_v36, %v501_v36  ;;  %v500_v42 = vadd.f32 %v499_v38, %v498_v34  ;;  %v502_v43 = vmul.f32 0.0625, %v478_v37 }
 0x2f5   :  { %v510_v49 = vsub.f32 %v458_v58, %v501_v36  ;;  %v509_v51 = vsub.f32 %v1095_v50, %v501_v36 }
 0x2f6   :  { %v507_v44 = vsub.f32 %v503_v39, %v505_v7  ;;  %v504_v45 = vmul.f32 0.0625, %v500_v42  ;;  %v506_v46 = vmul.f32 %v502_v43, %v502_v43  ;;  %v512_v56 = vsub.f32 %v460_v1, %v502_v43 }
 0x2f7   :  { %v511_v59 = vsub.f32 %v1097_v55, %v502_v43  ;;  %v983_v55 = vmov 1983009808  }
 0x2f8   :  { %v513_v47 = vadd.f32 1e-05, %v507_v44  ;;  %v508_v48 = vsub.f32 %v504_v45, %v506_v46  ;;  %v605_v6 = vunpack.c.l.s4 %v983_v55 }
 0x2fa   :  { %953 = vrsqrt.f32 %v513_v47  ;;  %v514_v13 = vadd.f32 1e-05, %v508_v48  ;;  %v606_v9 = vunpack.c.0.s8 %v605_v6 }
 0x2fc   :  { %955 = vrsqrt.f32 %v514_v13  ;;  %v609_v14 = vsub.s32 %v606_v9, %v608_v10 }
 0x307   :  { %v954_v52 = vpop.eup %953 }
 0x308   :  { %v518_v53 = vmul.f32 %v954_v52, %v510_v49  ;;  %v517_v54 = vmul.f32 %v954_v52, %v509_v51 }
 0x309   :  { %v956_v60 = vpop.eup %955 }
 0x30a   :  { %v523_v61 = vmul.f32 %v1082_v40, %v517_v54  ;;  %v520_v62 = vmul.f32 %v956_v60, %v512_v56  ;;  %v519_v63 = vmul.f32 %v956_v60, %v511_v59  ;;  %v524_v0 = vmul.f32 %v1091_v41, %v518_v53 }
 0x30c   :  { %v535_v2 = vadd.f32 %v530_v57, %v523_v61  ;;  %v525_v58 = vmul.f32 %v1082_v40, %v519_v63  ;;  %v526_v50 = vmul.f32 %v1091_v41, %v520_v62  ;;  %v536_v5 = vadd.f32 %v532_v3, %v524_v0 }
 0x30d   :  { %v640_v41 = vsub.s32 %v637_v15, %v608_v10 }
 0x30e   :  { %539 = vxpose.xlu1.b32.start [1/2] (short) (narrow) %v535_v2, 16  ;;  %v537_v4 = vadd.f32 %v530_v57, %v525_v58  ;;  %v538_v1 = vadd.f32 %v532_v3, %v526_v50 }
 0x310   :  { %571 = vxpose.xlu0.b32.start [1/2] (short) (narrow) %v537_v4, 16 }
 0x312   :  { %540 = vxpose.xlu1.b32.end [2/2] (short) (narrow) %v536_v5, 16 }
 0x314   :  { %572 = vxpose.xlu0.b32.end [2/2] (short) (narrow) %v538_v1, 16 }
 0x38a   :  { %v555_v16 = vpop.trf.xlu1 }
 0x38b   :  { %v610_v40 = vrot.slane %v555_v16, %v609_v14  ;;  %v603_v21 = vcombine.high %v555_v16, %v979_v25 }
 0x38c   :  { %v587_v17 = vpop.trf.xlu0 }
 0x38d   :  { %v625_v18 = vrot.slane %v587_v17, %v609_v14  ;;  %v618_v20 = vcombine.high %v587_v17, %v979_v25  ;;  %v617_v29 = vrot.slane %v603_v21, %v609_v14 }
 0x38e   :  { %v556_v19 = vpop.trf.xlu1 }
 0x38f   :  { %v633_v22 = vcombine.low %v610_v40, %v625_v18  ;;  %v634_v23 = vcombine.high %v610_v40, %v625_v18  ;;  %v676_v26 = vrot.slane %v556_v19, %v609_v14  ;;  %v632_v28 = vrot.slane %v618_v20, %v609_v14 }
 0x390   :  { %v588_v24 = vpop.trf.xlu0  ;;  %v669_v33 = vcombine.high %v556_v19, %v979_v25 }
 0x391   :  { %v641_v27 = vrot.slane %v633_v22, %v640_v41  ;;  %v691_v30 = vrot.slane %v588_v24, %v609_v14  ;;  %v648_v31 = vrot.slane %v634_v23, %v640_v41  ;;  %v684_v32 = vcombine.high %v588_v24, %v979_v25 }
 0x392   :  { %v649_v36 = vcombine.low %v617_v29, %v632_v28  ;;  %v683_v7 = vrot.slane %v669_v33, %v609_v14  ;;  %v650_v49 = vcombine.high %v617_v29, %v632_v28 }
 0x393   :  { %v665_v34 = vcombine.high %v641_v27, %v979_v25  ;;  %v700_v35 = vcombine.high %v676_v26, %v691_v30  ;;  %740 = vrot.lane.b32.xlu1 %v648_v31, %s985_s4  ;;  %v666_v37 = vcombine.high %v648_v31, %v979_v25  ;;  %v698_v39 = vrot.slane %v684_v32, %v609_v14 }
 0x394   :  { %v699_v42 = vcombine.low %v676_v26, %v691_v30  ;;  %v657_v43 = vrot.slane %v649_v36, %v640_v41  ;;  %v664_v53 = vrot.slane %v650_v49, %v640_v41 }
 0x395   :  { %736 = vrot.lane.b32.xlu0 %v665_v34, %s986_s12  ;;  %v714_v38 = vrot.slane %v700_v35, %v640_v41  ;;  %v715_v44 = vcombine.low %v683_v7, %v698_v39  ;;  %v716_v48 = vcombine.high %v683_v7, %v698_v39 }
 0x396   :  { %v707_v46 = vrot.slane %v699_v42, %v640_v41  ;;  %v667_v47 = vcombine.high %v657_v43, %v979_v25  ;;  %v668_v56 = vcombine.high %v664_v53, %v979_v25 }
 0x397   :  { %744 = vrot.lane.b32.xlu1 %v666_v37, %s987_s13  ;;  %v732_v45 = vcombine.high %v714_v38, %v979_v25  ;;  %v723_v13 = vrot.slane %v715_v44, %v640_v41  ;;  %v730_v52 = vrot.slane %v716_v48, %v640_v41 }
 0x398   :  { %v731_v51 = vcombine.high %v707_v46, %v979_v25 }
 0x399   :  { %768 = vrot.lane.b32.xlu0 %v714_v38, %s985_s4  ;;  %v733_v54 = vcombine.high %v723_v13, %v979_v25  ;;  %v734_v57 = vcombine.high %v730_v52, %v979_v25 }
 0x39b   :  { %748 = vrot.lane.b32.xlu1 %v657_v43, %s988_s14 }
 0x39d   :  { %772 = vrot.lane.b32.xlu0 %v732_v45, %s987_s13 }
 0x39f   :  { %752 = vrot.lane.b32.xlu1 %v667_v47, %s982_s8 }
 0x3a1   :  { %776 = vrot.lane.b32.xlu0 %v723_v13, %s988_s14 }
 0x3a3   :  { %764 = vrot.lane.b32.xlu1 %v731_v51, %s986_s12 }
 0x3a5   :  { %784 = vrot.lane.b32.xlu0 %v730_v52, %s981_s7 }
 0x3a7   :  { %756 = vrot.lane.b32.xlu1 %v664_v53, %s981_s7 }
 0x3a9   :  { %780 = vrot.lane.b32.xlu0 %v733_v54, %s982_s8 }
 0x3ab   :  { %760 = vrot.lane.b32.xlu1 %v668_v56, %s980_s0 }
 0x3ad   :  { %788 = vrot.lane.b32.xlu0 %v734_v57, %s980_s0 }
 0x405   :  { %v741_v59 = vpop.permute.xlu1 %740 }
 0x407   :  { %v737_v60 = vpop.permute.xlu0 %736 }
 0x408   :  { %v791_v58 = vsel %vm159_vm3, %v641_v27, %v737_v60 }
 0x409   :  { %v745_v61 = vpop.permute.xlu1 %744  ;;  %v793_v1 = vsel %vm792_vm4, %v791_v58, %v741_v59 }
 0x40a   :  { %v795_v10 = vsel %vm794_vm5, %v793_v1, %v745_v61 }
 0x40b   :  { %v769_v62 = vpop.permute.xlu0 %768 }
 0x40d   :  { %v749_v63 = vpop.permute.xlu1 %748 }
 0x40e   :  { %v797_v12 = vsel %vm796_vm6, %v795_v10, %v749_v63 }
 0x40f   :  { %v773_v0 = vpop.permute.xlu0 %772 }
 0x411   :  { %v753_v2 = vpop.permute.xlu1 %752 }
 0x412   :  { %v799_v14 = vsel %vm798_vm7, %v797_v12, %v753_v2 }
 0x413   :  { %v777_v3 = vpop.permute.xlu0 %776 }
 0x415   :  { %v765_v50 = vpop.permute.xlu1 %764 }
 0x416   :  { %v804_v4 = vsel %vm159_vm3, %v707_v46, %v765_v50 }
 0x417   :  { %v785_v5 = vpop.permute.xlu0 %784  ;;  %v805_v25 = vsel %vm792_vm4, %v804_v4, %v769_v62 }
 0x418   :  { %v806_v55 = vsel %vm794_vm5, %v805_v25, %v773_v0 }
 0x419   :  { %v757_v6 = vpop.permute.xlu1 %756  ;;  %v807_v9 = vsel %vm796_vm6, %v806_v55, %v777_v3 }
 0x41a   :  { %v801_v16 = vsel %vm800_vm8, %v799_v14, %v757_v6 }
 0x41b   :  { %v781_v8 = vpop.permute.xlu0 %780 }
 0x41c   :  { %v808_v11 = vsel %vm798_vm7, %v807_v9, %v781_v8 }
 0x41d   :  { %v761_v15 = vpop.permute.xlu1 %760  ;;  %v809_v17 = vsel %vm800_vm8, %v808_v11, %v785_v5 }
 0x41e   :  { %v803_v18 = vsel %vm802_vm9, %v801_v16, %v761_v15 }
 0x41f   :  { %v789_v40 = vpop.permute.xlu0 %788 }
 0x420   :  { %v810_v41 = vsel %vm802_vm9, %v809_v17, %v789_v40 }
 0x421   :  { %v813_v19 = vcombine.low %v803_v18, %v810_v41 }
 0x423   :  { %862 = vst.sshfl [vmem:[#allocation3] sm:$0x33 pattern:$0x76325410] %v813_v19 }
 0x424   :  { %968 = shalt.err (!%p965_p4)
}
 0x425   :  { %832 = dma.vmem_to_hbm [thread:$0]  %s830_s16, 64, %s1147_s5, [#allocation4]  }
 0x426   :  { %977 = dma.done.wait [#allocation4], 64  }
 0x427   :  { %978 = vsyncadd [#allocation4], 4294967232 }
 0x428   :  { %836 = vsyncpa [#allocation4], 1 }

</bundles_post_ra>
